<compile_context>
chip_gen: v7x
topology: tpu7x:2x2x1
jax: 0.10.0
libtpu: 0.0.40
codegen_flags: <defaults>
</compile_context>

<pallas_src>
import functools

import jax
import jax.numpy as jnp
from jax import lax
from jax.experimental import pallas as pl
from jax.experimental.pallas import tpu as pltpu


def _lm_head_softmax_max_kernel(h_ref, w_ref, prob_ref, idx_ref,
                                m_sc, s_sc, a_sc, *, vocab_size, tv):
    """Grid = (model, vocab_tile). One step: one logits tile -> online softmax/argmax."""
    v = pl.program_id(1)

    @pl.when(v == 0)
    def _():
        m_sc[...] = jnp.full_like(m_sc, -jnp.inf)
        s_sc[...] = jnp.zeros_like(s_sc)
        a_sc[...] = jnp.zeros_like(a_sc)

    # (B, H) @ (H, tv) -> (B, tv) logits for this vocab tile (MXU, f32 accumulate;
    # inputs may be bf16).
    logits = jnp.dot(h_ref[...], w_ref[...], preferred_element_type=jnp.float32)

    # Small (1, tv) column iota; broadcasting happens inside the selects.
    col = lax.broadcasted_iota(jnp.int32, (1, tv), 1)

    if vocab_size % tv != 0:  # static: only emitted when a partial last tile exists
        valid = vocab_size - v * tv          # dynamic scalar, 1 <= valid <= tv
        logits = jnp.where(col < valid, logits, -jnp.inf)

    # Per-row max and first-occurrence argmax within this tile.
    tile_max = jnp.max(logits, axis=-1, keepdims=True)
    big = jnp.int32(2_147_483_647)
    tile_arg = jnp.min(jnp.where(logits == tile_max, col, big),
                       axis=-1, keepdims=True) + v * tv

    # Online softmax update (running max / running sum of exp).
    new_max = jnp.maximum(m_sc[...], tile_max)
    s_sc[...] = (s_sc[...] * jnp.exp(m_sc[...] - new_max)
                 + jnp.sum(jnp.exp(logits - new_max), axis=-1, keepdims=True))
    # Strict '>' keeps the earliest index on cross-tile ties (torch.max convention).
    a_sc[...] = jnp.where(tile_max > m_sc[...], tile_arg, a_sc[...])
    m_sc[...] = new_max

    @pl.when(v == pl.num_programs(1) - 1)
    def _():
        # softmax value at its argmax = exp(max - max) / sum = 1 / sum.
        prob_ref[...] = pl.reciprocal(s_sc[...], approx=False)
        idx_ref[...] = a_sc[...]


def _pick_tv(vocab_size, hidden, itemsize, *, budget_bytes=24 << 20, cap=4096):
    """Largest multiple-of-128 vocab tile whose double-buffered W slab fits the budget.

    Collapses to a single full-vocab tile when the whole vocab fits (a full-extent
    last block dim is always legal, even if not a multiple of 128).
    """
    per_col = max(2 * hidden * itemsize, 1)      # one vocab column, double-buffered
    tv = int((budget_bytes // per_col) // 128 * 128)
    tv = max(128, min(tv, cap))
    if vocab_size <= tv:
        return vocab_size
    return tv


def ensemble_lm_head_softmax_max(h, w, *, tv=None):
    """h: (M, B, H), w: (M, H, V)  ->  (max_prob (M, B, 1) f32, max_idx (M, B, 1) i32).

    All M LM-head passes run in one pallas_call; the leading model axis is
    "parallel" so v7x's two TensorCores each take one model.
    """
    n_models, B, H = h.shape
    n_models2, H2, V = w.shape
    assert n_models == n_models2 and H == H2
    itemsize = jnp.dtype(w.dtype).itemsize
    if tv is None:
        tv = _pick_tv(V, H, itemsize)
    n_tiles = pl.cdiv(V, tv)

    # Double-buffered W tile + h block must fit the scoped VMEM limit.
    vmem_need = 2 * (H * tv + B * H) * itemsize + (2 << 20)
    vmem_limit = int(min(max(vmem_need, 32 << 20), 64 << 20))  # stay v7x-safe (64 MiB)

    cost = pl.CostEstimate(
        flops=2 * n_models * B * H * V,
        transcendentals=n_models * B * V,
        bytes_accessed=(n_models * H * V + n_models * B * H) * itemsize
                       + n_models * B * (4 + 4),
    )

    kernel = functools.partial(_lm_head_softmax_max_kernel, vocab_size=V, tv=tv)

    return pl.pallas_call(
        kernel,
        out_shape=(jax.ShapeDtypeStruct((n_models, B, 1), jnp.float32),
                   jax.ShapeDtypeStruct((n_models, B, 1), jnp.int32)),
        grid_spec=pltpu.PrefetchScalarGridSpec(
            num_scalar_prefetch=0,
            grid=(n_models, n_tiles),
            in_specs=[
                pl.BlockSpec((None, B, H), lambda m, v: (m, 0, 0)),
                pl.BlockSpec((None, H, tv), lambda m, v: (m, 0, v)),
            ],
            out_specs=[
                pl.BlockSpec((None, B, 1), lambda m, v: (m, 0, 0)),
                pl.BlockSpec((None, B, 1), lambda m, v: (m, 0, 0)),
            ],
            scratch_shapes=[
                pltpu.VMEM((B, 1), jnp.float32),   # running max
                pltpu.VMEM((B, 1), jnp.float32),   # running sum of exp
                pltpu.VMEM((B, 1), jnp.int32),     # running argmax
            ],
        ),
        compiler_params=pltpu.CompilerParams(
            dimension_semantics=("parallel", "arbitrary"),
            vmem_limit_bytes=vmem_limit),
        cost_estimate=cost,
    )(h, w)


def ensemble_forward(h1, w1, h2, w2, *, tv=None):
    """Pallas implementation of EnsembleModel.forward's numeric core.

    Returns (selected_token_id (B,), max_prob1 (B,), max_prob2 (B,)).
    # TODO(synk): tokenizer encode/decode, prompt-template string ops and the
    # full 33B transformer bodies have no Pallas equivalent; inputs here are the
    # last-token hidden states + LM-head weights of each model.
    """
    h = jnp.stack([h1, h2])
    w = jnp.stack([w1, w2])
    probs, idxs = ensemble_lm_head_softmax_max(h, w, tv=tv)
    p1, p2 = probs[0, :, 0], probs[1, :, 0]
    i1, i2 = idxs[0, :, 0], idxs[1, :, 0]
    # torch: `if max_prob1 > max_prob2: model1 else model2` (ties -> model2).
    selected = jnp.where(p1 > p2, i1, i2)
    return selected, p1, p2


def _reference(h, w):
    logits = h.astype(jnp.float32) @ w.astype(jnp.float32)
    probs = jax.nn.softmax(logits, axis=-1)
    return jnp.max(probs, axis=-1), jnp.argmax(probs, axis=-1).astype(jnp.int32)


if __name__ == "__main__":
    B, H, V = 8, 256, 1024   # small stand-in shapes: batch, hidden, vocab
    key = jax.random.PRNGKey(0)
    k1, k2, k3, k4 = jax.random.split(key, 4)
    # Synthetic "last hidden states" and LM-head weights for the two models.
    h1 = jax.random.normal(k1, (B, H), dtype=jnp.float32)
    h2 = jax.random.normal(k2, (B, H), dtype=jnp.float32)
    w1 = jax.random.normal(k3, (H, V), dtype=jnp.float32) * 0.05
    w2 = jax.random.normal(k4, (H, V), dtype=jnp.float32) * 0.05

    # Stream hidden states / LM-head weights in bf16 (halves HBM bytes);
    # the MXU still accumulates in f32 via preferred_element_type.
    h1b, h2b = h1.astype(jnp.bfloat16), h2.astype(jnp.bfloat16)
    w1b, w2b = w1.astype(jnp.bfloat16), w2.astype(jnp.bfloat16)

    selected, p1, p2 = jax.block_until_ready(ensemble_forward(h1b, w1b, h2b, w2b))

    # Cross-check against a pure-JAX reference of the same math (f32 on bf16 data).
    rp1, ri1 = _reference(h1b, w1b)
    rp2, ri2 = _reference(h2b, w2b)
    ref_sel = jnp.where(rp1 > rp2, ri1, ri2)
    assert jnp.allclose(p1, rp1, rtol=1e-3, atol=1e-4)
    assert jnp.allclose(p2, rp2, rtol=1e-3, atol=1e-4)
    assert jnp.array_equal(selected, ref_sel)

    # Extra check: vocab size that does NOT divide the tile (masked last tile)
    # and multi-tile online softmax/argmax.
    V2 = 896   # tv = 512 -> 2 tiles, last tile has 384 valid columns
    k5, k6 = jax.random.split(k4)
    w1c = (jax.random.normal(k5, (H, V2), dtype=jnp.float32) * 0.05).astype(jnp.bfloat16)
    w2c = (jax.random.normal(k6, (H, V2), dtype=jnp.float32) * 0.05).astype(jnp.bfloat16)
    sel_c, p1c, p2c = jax.block_until_ready(
        ensemble_forward(h1b, w1c, h2b, w2c, tv=512))
    rp1c, ri1c = _reference(h1b, w1c)
    rp2c, ri2c = _reference(h2b, w2c)
    assert jnp.allclose(p1c, rp1c, rtol=1e-3, atol=1e-4)
    assert jnp.allclose(p2c, rp2c, rtol=1e-3, atol=1e-4)
    assert jnp.array_equal(sel_c, jnp.where(rp1c > rp2c, ri1c, ri2c))

    print("KERNEL_OK")
</pallas_src>

<mosaic_0001>
module attributes {stable_mosaic.version = 11 : i64} {
  func.func @_lm_head_softmax_max_kernel(%arg0: i32, %arg1: i32, %arg2: memref<1x8x256xbf16, #tpu.memory_space<vmem>>, %arg3: memref<1x256x1024xbf16, #tpu.memory_space<vmem>>, %arg4: memref<1x8x1xf32, #tpu.memory_space<vmem>>, %arg5: memref<1x8x1xi32, #tpu.memory_space<vmem>>, %arg6: memref<8x1xf32, #tpu.memory_space<vmem>>, %arg7: memref<8x1xf32, #tpu.memory_space<vmem>>, %arg8: memref<8x1xi32, #tpu.memory_space<vmem>>) attributes {dimension_semantics = [#tpu.dimension_semantics<parallel>, #tpu.dimension_semantics<arbitrary>], iteration_bounds = array<i64: 2, 1>, scalar_prefetch = 0 : i64, scratch_operands = 3 : i64, tpu.core_type = #tpu.core_type<tc>, window_params = [{transform_indices = @transform_0, window_bounds = array<i64: 1, 8, 256>}, {transform_indices = @transform_1, window_bounds = array<i64: 1, 256, 1024>}, {transform_indices = @transform_2, window_bounds = array<i64: 1, 8, 1>}, {transform_indices = @transform_3, window_bounds = array<i64: 1, 8, 1>}]} {
    %c0_i32 = arith.constant 0 : i32
    %0 = arith.cmpi eq, %arg1, %c0_i32 : i32
    %1 = arith.extui %0 : i1 to i32
    %c0_i32_0 = arith.constant 0 : i32
    %2 = arith.cmpi ne, %1, %c0_i32_0 : i32
    scf.if %2 {
      %cst_27 = arith.constant 0xFF800000 : f32
      %45 = vector.broadcast %cst_27 : f32 to vector<8x1xf32>
      %c0_28 = arith.constant 0 : index
      %c0_29 = arith.constant 0 : index
      %46 = vector.load %arg6[%c0_28, %c0_29] : memref<8x1xf32, #tpu.memory_space<vmem>>, vector<8x1xf32>
      tpu.vector_store %arg6[%c0_28, %c0_29], %45 {strides = array<i32>} : memref<8x1xf32, #tpu.memory_space<vmem>>, vector<8x1xf32>,
      %cst_30 = arith.constant 0.000000e+00 : f32
      %47 = vector.broadcast %cst_30 : f32 to vector<8x1xf32>
      %c0_31 = arith.constant 0 : index
      %c0_32 = arith.constant 0 : index
      %48 = vector.load %arg7[%c0_31, %c0_32] : memref<8x1xf32, #tpu.memory_space<vmem>>, vector<8x1xf32>
      tpu.vector_store %arg7[%c0_31, %c0_32], %47 {strides = array<i32>} : memref<8x1xf32, #tpu.memory_space<vmem>>, vector<8x1xf32>,
      %c0_i32_33 = arith.constant 0 : i32
      %49 = vector.broadcast %c0_i32_33 : i32 to vector<8x1xi32>
      %c0_34 = arith.constant 0 : index
      %c0_35 = arith.constant 0 : index
      %50 = vector.load %arg8[%c0_34, %c0_35] : memref<8x1xi32, #tpu.memory_space<vmem>>, vector<8x1xi32>
      tpu.vector_store %arg8[%c0_34, %c0_35], %49 {strides = array<i32>} : memref<8x1xi32, #tpu.memory_space<vmem>>, vector<8x1xi32>,
    } else {
    }
    %c0 = arith.constant 0 : index
    %c0_1 = arith.constant 0 : index
    %c0_2 = arith.constant 0 : index
    %3 = vector.load %arg2[%c0, %c0_1, %c0_2] : memref<1x8x256xbf16, #tpu.memory_space<vmem>>, vector<1x8x256xbf16>
    %4 = vector.shape_cast %3 : vector<1x8x256xbf16> to vector<8x256xbf16>
    %c0_3 = arith.constant 0 : index
    %c0_4 = arith.constant 0 : index
    %c0_5 = arith.constant 0 : index
    %5 = vector.load %arg3[%c0_3, %c0_4, %c0_5] : memref<1x256x1024xbf16, #tpu.memory_space<vmem>>, vector<1x256x1024xbf16>
    %6 = vector.shape_cast %5 : vector<1x256x1024xbf16> to vector<256x1024xbf16>
    %cst = arith.constant dense<0.000000e+00> : vector<8x1024xf32>
    %7 = tpu.matmul %4, %6, %cst {dimension_numbers = #tpu.dot_dimension_numbers<[1], [0], [0], [1], [0, 0, 1, 1], [], []>} : vector<8x256xbf16>, vector<256x1024xbf16>, vector<8x1024xf32> -> vector<8x1024xf32>
    %8 = tpu.iota {dimensions = array<i32: 1>} : vector<1x1024xi32>
    %cst_6 = arith.constant dense<0xFF800000> : vector<8xf32>
    %9 = vector.multi_reduction <maximumf>, %7, %cst_6 [1] : vector<8x1024xf32> to vector<8xf32>
    %10 = vector.shape_cast %9 : vector<8xf32> to vector<8x1xf32>
    %11 = vector.broadcast %10 : vector<8x1xf32> to vector<8x1024xf32>
    %12 = arith.cmpf oeq, %7, %11 : vector<8x1024xf32>
    %c2147483647_i32 = arith.constant 2147483647 : i32
    %13 = vector.shape_cast %8 : vector<1x1024xi32> to vector<1x1024xi32>
    %14 = vector.broadcast %13 : vector<1x1024xi32> to vector<8x1024xi32>
    %15 = vector.broadcast %c2147483647_i32 : i32 to vector<8x1024xi32>
    %16 = arith.select %12, %14, %15 : vector<8x1024xi1>, vector<8x1024xi32>
    %cst_7 = arith.constant dense<2147483647> : vector<8xi32>
    %17 = vector.multi_reduction <minsi>, %16, %cst_7 [1] : vector<8x1024xi32> to vector<8xi32>
    %18 = vector.shape_cast %17 : vector<8xi32> to vector<8x1xi32>
    %c1024_i32 = arith.constant 1024 : i32
    %19 = arith.muli %arg1, %c1024_i32 : i32
    %20 = vector.broadcast %19 : i32 to vector<8x1xi32>
    %21 = arith.addi %18, %20 : vector<8x1xi32>
    %c0_8 = arith.constant 0 : index
    %c0_9 = arith.constant 0 : index
    %22 = vector.load %arg6[%c0_8, %c0_9] : memref<8x1xf32, #tpu.memory_space<vmem>>, vector<8x1xf32>
    %23 = arith.maximumf %22, %10 : vector<8x1xf32>
    %c0_10 = arith.constant 0 : index
    %c0_11 = arith.constant 0 : index
    %24 = vector.load %arg7[%c0_10, %c0_11] : memref<8x1xf32, #tpu.memory_space<vmem>>, vector<8x1xf32>
    %c0_12 = arith.constant 0 : index
    %c0_13 = arith.constant 0 : index
    %25 = vector.load %arg6[%c0_12, %c0_13] : memref<8x1xf32, #tpu.memory_space<vmem>>, vector<8x1xf32>
    %26 = arith.subf %25, %23 : vector<8x1xf32>
    %27 = math.exp %26 : vector<8x1xf32>
    %28 = arith.mulf %24, %27 : vector<8x1xf32>
    %29 = vector.broadcast %23 : vector<8x1xf32> to vector<8x1024xf32>
    %30 = arith.subf %7, %29 : vector<8x1024xf32>
    %31 = math.exp %30 : vector<8x1024xf32>
    %cst_14 = arith.constant dense<0.000000e+00> : vector<8xf32>
    %32 = vector.multi_reduction <add>, %31, %cst_14 [1] : vector<8x1024xf32> to vector<8xf32>
    %33 = vector.shape_cast %32 : vector<8xf32> to vector<8x1xf32>
    %34 = arith.addf %28, %33 : vector<8x1xf32>
    %c0_15 = arith.constant 0 : index
    %c0_16 = arith.constant 0 : index
    %35 = vector.load %arg7[%c0_15, %c0_16] : memref<8x1xf32, #tpu.memory_space<vmem>>, vector<8x1xf32>
    tpu.vector_store %arg7[%c0_15, %c0_16], %34 {strides = array<i32>} : memref<8x1xf32, #tpu.memory_space<vmem>>, vector<8x1xf32>,
    %c0_17 = arith.constant 0 : index
    %c0_18 = arith.constant 0 : index
    %36 = vector.load %arg6[%c0_17, %c0_18] : memref<8x1xf32, #tpu.memory_space<vmem>>, vector<8x1xf32>
    %37 = arith.cmpf ogt, %10, %36 : vector<8x1xf32>
    %c0_19 = arith.constant 0 : index
    %c0_20 = arith.constant 0 : index
    %38 = vector.load %arg8[%c0_19, %c0_20] : memref<8x1xi32, #tpu.memory_space<vmem>>, vector<8x1xi32>
    %39 = arith.select %37, %21, %38 : vector<8x1xi1>, vector<8x1xi32>
    %c0_21 = arith.constant 0 : index
    %c0_22 = arith.constant 0 : index
    %40 = vector.load %arg8[%c0_21, %c0_22] : memref<8x1xi32, #tpu.memory_space<vmem>>, vector<8x1xi32>
    tpu.vector_store %arg8[%c0_21, %c0_22], %39 {strides = array<i32>} : memref<8x1xi32, #tpu.memory_space<vmem>>, vector<8x1xi32>,
    %c0_23 = arith.constant 0 : index
    %c0_24 = arith.constant 0 : index
    %41 = vector.load %arg6[%c0_23, %c0_24] : memref<8x1xf32, #tpu.memory_space<vmem>>, vector<8x1xf32>
    tpu.vector_store %arg6[%c0_23, %c0_24], %23 {strides = array<i32>} : memref<8x1xf32, #tpu.memory_space<vmem>>, vector<8x1xf32>,
    %c0_i32_25 = arith.constant 0 : i32
    %42 = arith.cmpi eq, %arg1, %c0_i32_25 : i32
    %43 = arith.extui %42 : i1 to i32
    %c0_i32_26 = arith.constant 0 : i32
    %44 = arith.cmpi ne, %43, %c0_i32_26 : i32
    scf.if %44 {
      %c0_27 = arith.constant 0 : index
      %c0_28 = arith.constant 0 : index
      %45 = vector.load %arg7[%c0_27, %c0_28] : memref<8x1xf32, #tpu.memory_space<vmem>>, vector<8x1xf32>
      %46 = tpu.reciprocal %45 : vector<8x1xf32> -> vector<8x1xf32>
      %c0_29 = arith.constant 0 : index
      %c0_30 = arith.constant 0 : index
      %c0_31 = arith.constant 0 : index
      %47 = vector.load %arg4[%c0_29, %c0_30, %c0_31] : memref<1x8x1xf32, #tpu.memory_space<vmem>>, vector<1x8x1xf32>
      %48 = vector.shape_cast %47 : vector<1x8x1xf32> to vector<8x1xf32>
      %49 = vector.shape_cast %46 : vector<8x1xf32> to vector<1x8x1xf32>
      tpu.vector_store %arg4[%c0_29, %c0_30, %c0_31], %49 {strides = array<i32>} : memref<1x8x1xf32, #tpu.memory_space<vmem>>, vector<1x8x1xf32>,
      %c0_32 = arith.constant 0 : index
      %c0_33 = arith.constant 0 : index
      %50 = vector.load %arg8[%c0_32, %c0_33] : memref<8x1xi32, #tpu.memory_space<vmem>>, vector<8x1xi32>
      %c0_34 = arith.constant 0 : index
      %c0_35 = arith.constant 0 : index
      %c0_36 = arith.constant 0 : index
      %51 = vector.load %arg5[%c0_34, %c0_35, %c0_36] : memref<1x8x1xi32, #tpu.memory_space<vmem>>, vector<1x8x1xi32>
      %52 = vector.shape_cast %51 : vector<1x8x1xi32> to vector<8x1xi32>
      %53 = vector.shape_cast %50 : vector<8x1xi32> to vector<1x8x1xi32>
      tpu.vector_store %arg5[%c0_34, %c0_35, %c0_36], %53 {strides = array<i32>} : memref<1x8x1xi32, #tpu.memory_space<vmem>>, vector<1x8x1xi32>,
    } else {
    }
    return
  }
  func.func @transform_0(%arg0: i32, %arg1: i32) -> (i32, i32, i32) {
    %c0_i32 = arith.constant 0 : i32
    %c0_i32_0 = arith.constant 0 : i32
    %c0_i32_1 = arith.constant 0 : i32
    return %arg0, %c0_i32, %c0_i32_0 : i32, i32, i32
  }
  func.func @transform_1(%arg0: i32, %arg1: i32) -> (i32, i32, i32) {
    %c0_i32 = arith.constant 0 : i32
    %c0_i32_0 = arith.constant 0 : i32
    return %arg0, %c0_i32, %arg1 : i32, i32, i32
  }
  func.func @transform_2(%arg0: i32, %arg1: i32) -> (i32, i32, i32) {
    %c0_i32 = arith.constant 0 : i32
    %c0_i32_0 = arith.constant 0 : i32
    %c0_i32_1 = arith.constant 0 : i32
    return %arg0, %c0_i32, %c0_i32_0 : i32, i32, i32
  }
  func.func @transform_3(%arg0: i32, %arg1: i32) -> (i32, i32, i32) {
    %c0_i32 = arith.constant 0 : i32
    %c0_i32_0 = arith.constant 0 : i32
    %c0_i32_1 = arith.constant 0 : i32
    return %arg0, %c0_i32, %c0_i32_0 : i32, i32, i32
  }
}

</mosaic_0001>

<bundles_post_ra>
// kernel: tpu_custom_call.1
= control target key start
LH: loop header
LB: loop body
LE: loop exit
PB: predicated region body
PF: predicated region fallthrough
CT: control target
= control target key end

     0   :  { %9 = vsyncpa [#allocation6], 0  ;;  %s2241_s0 = inlined_call_operand.hbm [shape: bf16[2,8,256], index: 0, kind: input, shape index: {}]   ;;  %s2242_s1 = inlined_call_operand.hbm [shape: bf16[2,256,1024], index: 1, kind: input, shape index: {}]   ;;  %s2243_s2 = inlined_call_operand.vmem [shape: f32[2,8,1], index: 2, kind: output, shape index: {0}]   ;;  %s2244_s3 = inlined_call_operand.vmem [shape: s32[2,8,1], index: 3, kind: output, shape index: {1}]  }
   0x1   :  { %11 = vsyncpa [#allocation6 + $0x1], 0 }
   0x2   :  { %12 = vsyncpa [#allocation8], 0 }
   0x3   :  { %14 = vsyncpa [#allocation8 + $0x1], 0  ;;  %s1840_s12 = smov 0   ;;  %s1842_s13 = smov 0  }
   0x4   :  { %s1844_s14 = smov 0   ;;  %s1846_s15 = smov 0  }
   0x5   :  { %s1848_s16 = smov 0   ;;  %s1850_s17 = smov 0  }
   0x6 LB: > { %s1460_s18 = sadd.s32 4294967295, %s1811_s17   ;;  %s32_s19 = sadd.s32 1, %s1807_s16  ;;  %s1811_s17 = sphi %s1850_s17, %s20_s17   ;;  %s1807_s16 = sphi %s1848_s16, %s2257_s16   ;;  %s1803_s15 = sphi %s1846_s15, %s2256_s15   ;;  %s1799_s14 = sphi %s1844_s14, %s2255_s14   ;;  %s1795_s13 = sphi %s1842_s13, %s2254_s13   ;;  %s1791_s12 = sphi %s1840_s12, %s2253_s12  }
   0x7   : > { %p34_p0 = scmp.ge.s32.totalorder %s32_s19, 2  ;;  %s39_s20 = sadd.s32 1, %s1799_s14 }
   0x8   : > { %p46_p1 = scmp.ne.s32.totalorder %s1799_s14, %s1795_s13  ;;  %p47_p2 = scmp.eq.s32.totalorder %s1811_s17, 0 }
   0x9   : > { %s2259_s19 = smov (%p34_p0, %s32_s19), 0  ;;  %p52_p4 = scmp.ne.s32.totalorder %s1795_s13, %s1791_s12 }
   0xa   : > { %p1876_p3 = por %p47_p2, %p46_p1  ;;  %s36_s22 = ssub.s32 %s1807_s16, %s2259_s19 }
   0xb   : > { %p53_p5 = scmp.eq.s32.totalorder %s1460_s18, 0  ;;  %p37_p6 = scmp.eq.s32.totalorder %s36_s22, 0 }
   0xc   : > { %p1620_p8 = scmp.lt.s32.totalorder %s1811_s17, 2  ;;  %s1892_s25 = sand.u32 1, %s1799_s14  }
   0xd   : > { %p1883_p7 = por %p53_p5, %p52_p4  ;;  %s1607_s26 = sshll.u32 %s1807_s16, 7 }
   0xe   : > { %s1889_s24 = scalar_select %p37_p6, %s1799_s14, %s39_s20  }
   0xf   : > { %s2247_s23 = scalar_select %p1883_p7, 1, 0 }
  0x10   : > { %s1464_s27 = sshll.u32 %s1892_s25, 3  ;;  %s1899_s30 = scalar_lea.hbm %s2241_s0, %s1607_s26 }
  0x11   : > { %s160_s4 = scalar_lea.vmem [#allocation5], %s1464_s27  ;;  %p1903_p9 = pnand %p1620_p8, %p1876_p3 }
  0x12   : > { %s168_s5 = sshll.u32 %s160_s4, 4  ;;  %s157_s7 = scalar_lea.sflag [#allocation6], %s1892_s25  ;;  %s1907_s5 = int_to_ptr.vmem [resolvable:$true] %s168_s5 }
  0x13   : > { %s1697_s8 = scalar_lea.hbm %s1899_s30, 128  ;;  %p1699_p13 = pneg %p1903_p9 }
  0x14   : > { %p1698_p12 = scmp.ne.s32.totalorder %s1899_s30, %s1697_s8  ;;  %s1702_s11 = scalar_lea.hbm %s2241_s0, 256 }
  0x15   : > { %p1703_p2 = scmp.lt.u32.totalorder %s1899_s30, %s2241_s0  ;;  %p1704_p3 = scmp.lt.u32.totalorder %s1702_s11, %s1697_s8 }
  0x16   : > { %p1700_p0 = pnand %p1699_p13, %p1698_p12  ;;  %p1706_p5 = scmp.lt.u32.totalorder %s1697_s8, %s1899_s30 }
  0x17   : > { %p1705_p4 = por %p1704_p3, %p1703_p2 }
  0x18   : > { %p1701_p1 = pneg %p1700_p0 }
  0x19   : > { %p1707_p6 = por %p1706_p5, %p1705_p4 }
  0x1b   : > { %p1708_p8 = pnand %p1707_p6, %p1701_p1 }
  0x1d   : > { %1711 = shalt.err (!%p1708_p8)
}
  0x1e   : > { %s1712_s20 = scalar_lea.vmem %s1907_s5, 128  ;;  %s1813_s21 = smov [#allocation5]  }
  0x1f   : > { %p1713_p12 = scmp.ne.s32.totalorder %s1907_s5, %s1712_s20  ;;  %s1717_s22 = sshll.u32 %s1813_s21, 4  ;;  %s1718_s22 = int_to_ptr.vmem [resolvable:$false] %s1717_s22 }
  0x20   : > { %s1719_s26 = scalar_lea.vmem %s1718_s22, 256  ;;  %p1720_p11 = scmp.lt.s32.totalorder %s1907_s5, %s1718_s22 }
  0x21   : > { %p1715_p0 = pnand %p1713_p12, %p1699_p13  ;;  %p1721_p2 = scmp.lt.s32.totalorder %s1719_s26, %s1712_s20 }
  0x23   : > { %p1716_p10 = pneg %p1715_p0  ;;  %p1722_p3 = por %p1721_p2, %p1720_p11 }
  0x25   : > { %p1723_p4 = pnand %p1722_p3, %p1716_p10 }
  0x27   : > { %1726 = shalt.err (!%p1723_p4)
}
  0x28   : > { %1616 = dma.hbm_to_vmem [thread:$0]  (!%p1903_p9), %s1899_s30, 128, %s1907_s5, %s157_s7  }
  0x29   : > { %p2249_p1 = scmp.lt.s32.totalorder %s1811_s17, 3  ;;  %p2250_p5 = scmp.ge.s32.totalorder %s1811_s17, 1 }
  0x2a   : > { %s1467_s28 = sshll.u32 %s1892_s25, 10  ;;  %s1608_s29 = sshll.u32 %s1807_s16, 14 }
  0x2b   : > { %p1941_p6 = pnand %p2250_p5, %p2249_p1  ;;  %s1950_s9 = scalar_lea.hbm %s2242_s1, %s1608_s29 }
  0x2c   : > { %s179_s10 = scalar_lea.vmem [#allocation7], %s1467_s28  ;;  %s176_s30 = scalar_lea.sflag [#allocation8], %s1892_s25 }
  0x2d   : > { %s188_s11 = sshll.u32 %s179_s10, 4  ;;  %s1727_s5 = scalar_lea.hbm %s1950_s9, 16384  ;;  %s1952_s11 = int_to_ptr.vmem [resolvable:$true] %s188_s11 }
  0x2e   : > { %p1728_p10 = scmp.ne.s32.totalorder %s1950_s9, %s1727_s5  ;;  %s1732_s18 = scalar_lea.hbm %s2242_s1, 32768 }
  0x2f   : > { %p1733_p12 = scmp.lt.u32.totalorder %s1950_s9, %s2242_s1  ;;  %p1734_p0 = scmp.lt.u32.totalorder %s1732_s18, %s1727_s5 }
  0x30   : > { %p1730_p11 = pnand %p1728_p10, %p1699_p13  ;;  %p1736_p3 = scmp.lt.u32.totalorder %s1727_s5, %s1950_s9 }
  0x31   : > { %p1735_p2 = por %p1734_p0, %p1733_p12 }
  0x32   : > { %p1731_p8 = pneg %p1730_p11 }
  0x33   : > { %p1737_p4 = por %p1736_p3, %p1735_p2 }
  0x35   : > { %p1738_p1 = pnand %p1737_p4, %p1731_p8 }
  0x37   : > { %1741 = shalt.err (!%p1738_p1)
}
  0x38   : > { %s1742_s22 = scalar_lea.vmem %s1952_s11, 16384  ;;  %s1814_s26 = smov [#allocation7]  }
  0x39   : > { %p1743_p5 = scmp.ne.s32.totalorder %s1952_s11, %s1742_s22  ;;  %s1747_s28 = sshll.u32 %s1814_s26, 4  ;;  %s1748_s28 = int_to_ptr.vmem [resolvable:$false] %s1747_s28 }
  0x3a   : > { %s1749_s29 = scalar_lea.vmem %s1748_s28, 32768  ;;  %p1750_p7 = scmp.lt.s32.totalorder %s1952_s11, %s1748_s28 }
  0x3b   : > { %p1745_p10 = pnand %p1743_p5, %p1699_p13  ;;  %p1751_p12 = scmp.lt.s32.totalorder %s1749_s29, %s1742_s22 }
  0x3d   : > { %p1746_p11 = pneg %p1745_p10  ;;  %p1752_p0 = por %p1751_p12, %p1750_p7 }
  0x3f   : > { %p1753_p2 = pnand %p1752_p0, %p1746_p11 }
  0x41   : > { %1756 = shalt.err (!%p1753_p2)
}
  0x42   : > { %s1815_s4 = smov 512   ;;  %s1816_s8 = smov 32  }
  0x43   : > { %1619 = dma.hbm_to_vmem [thread:$0]  (!%p1903_p9), %s1950_s9, 16384, %s1952_s11, %s176_s30, %s1815_s4, %s1815_s4, %s1816_s8  }
  0x44   : > { %200 = sbr.rel (%p1941_p6) target bundleno = 896 (0x380), region = 28  ;;  %s202_s10 = sand.u32 (!%p1941_p6), 1, %s1795_s13  }
  0x45   : > { %s1471_s5 = sshll.u32 (!%p1941_p6), %s202_s10, 3  ;;  %s203_s7 = scalar_lea.sflag (!%p1941_p6), [#allocation6], %s202_s10 }
  0x46   : > { %s1983_s12 = scalar_lea.vmem (!%p1941_p6), [#allocation5], %s1471_s5  ;;  %p2252_p7 = scmp.ne.s32.totalorder (!%p1941_p6), %s2247_s23, 0 }
  0x4b   : > { %1782 = dma.done.wait (%p2252_p7), %s203_s7, 128  }
  0x4c   : > { %1784 = vsyncadd (%p2252_p7), %s203_s7, 4294967168  ;;  %s1472_s18 = sshll.u32 %s202_s10, 10  ;;  %s212_s6 = scalar_lea.sflag [#allocation8], %s202_s10 }
  0x4d   : > { %s1989_s25 = scalar_lea.vmem [#allocation7], %s1472_s18 }
  0x4e   : > { %1786 = dma.done.wait (%p2252_p7), %s212_s6, 16384  }
  0x4f   : > { %1788 = vsyncadd (%p2252_p7), %s212_s6, 4294950912  ;;  %v264_v0 = vld [vmem:[%s1989_s25] sm:$0xff]  ;;  %v265_v2 = vld [vmem:[%s1989_s25 + $0x8] sm:$0xff]  ;;  %vm259_vm0 = vcmask 7168   ;;  %p247_p9 = scmp.lt.s32.totalorder %s1803_s15, 1 }
  0x50   : > { %v268_v1 = vld [vmem:[%s1989_s25 + $0x20] sm:$0xff]  ;;  %v269_v4 = vld [vmem:[%s1989_s25 + $0x28] sm:$0xff]  ;;  %v2024_v53 = vld [vmem:[%s1983_s12] sm:$0xff] }
  0x51   : > { %v1478_v3 = vcombine.high %v264_v0, %v268_v1  ;;  %v1477_v5 = vcombine.low %v264_v0, %v268_v1  ;;  %v272_v6 = vld [vmem:[%s1989_s25 + $0x40] sm:$0xff]  ;;  %v1480_v8 = vcombine.high %v265_v2, %v269_v4  ;;  %v1479_v9 = vcombine.low %v265_v2, %v269_v4  ;;  %v273_v11 = vld [vmem:[%s1989_s25 + $0x48] sm:$0xff]  ;;  %s2261_s15 = smov (!%p247_p9, %s1803_s15), 1 }
  0x52   : > { %v276_v7 = vld [vmem:[%s1989_s25 + $0x60] sm:$0xff]  ;;  %v277_v12 = vld [vmem:[%s1989_s25 + $0x68] sm:$0xff]  ;;  %v2030_v57 = vcombine.high %v2024_v53, %v2024_v53  ;;  %s1473_s23 = sshll.u32 %s2261_s15, 3 }
  0x53   : > { %v1486_v10 = vcombine.high %v272_v6, %v276_v7  ;;  %v280_v13 = vld [vmem:[%s1989_s25 + $0x80] sm:$0xff]  ;;  %1039 = vmatprep.subr.bf16.mxu0 %v1478_v3  ;;  %v1488_v14 = vcombine.high %v273_v11, %v277_v12  ;;  %v281_v16 = vld [vmem:[%s1989_s25 + $0x88] sm:$0xff]  ;;  %1080 = vmatprep.subr.bf16.mxu1 %v1480_v8  ;;  %v1485_v18 = vcombine.low %v272_v6, %v276_v7  ;;  %s254_s11 = scalar_lea.vmem %s2244_s3, %s1473_s23  ;;  %s250_s21 = scalar_lea.vmem %s2243_s2, %s1473_s23 }
  0x54   : > { %v284_v15 = vld [vmem:[%s1989_s25 + $0xa0] sm:$0xff]  ;;  %v285_v17 = vld [vmem:[%s1989_s25 + $0xa8] sm:$0xff]  ;;  %1040 = vmatpush1.bf16.msra.mxu0 %v1477_v5  ;;  %1081 = vmatpush1.bf16.msra.mxu1 %v1479_v9  ;;  %v1487_v19 = vcombine.low %v273_v11, %v277_v12 }
  0x55   : > { %1041 = vmatprep.subr.bf16.mxu0 %v1486_v10  ;;  %v1494_v20 = vcombine.high %v280_v13, %v284_v15  ;;  %1082 = vmatprep.subr.bf16.mxu1 %v1488_v14  ;;  %v1496_v21 = vcombine.high %v281_v16, %v285_v17  ;;  %v288_v22 = vld [vmem:[%s1989_s25 + $0xc0] sm:$0xff]  ;;  %v289_v24 = vld [vmem:[%s1989_s25 + $0xc8] sm:$0xff]  ;;  %v1493_v26 = vcombine.low %v280_v13, %v284_v15 }
  0x56   : > { %v292_v23 = vld [vmem:[%s1989_s25 + $0xe0] sm:$0xff]  ;;  %v293_v25 = vld [vmem:[%s1989_s25 + $0xe8] sm:$0xff]  ;;  %v1495_v27 = vcombine.low %v281_v16, %v285_v17  ;;  %1071 = vmatprep.mubr.bf16.mxu0 %v2030_v57  ;;  %1112 = vmatprep.mubr.bf16.mxu1 %v2030_v57 }
  0x57   : > { %v1502_v28 = vcombine.high %v288_v22, %v292_v23  ;;  %v1504_v29 = vcombine.high %v289_v24, %v293_v25  ;;  %v296_v30 = vld [vmem:[%s1989_s25 + $0x100] sm:$0xff]  ;;  %v297_v32 = vld [vmem:[%s1989_s25 + $0x108] sm:$0xff]  ;;  %v1501_v34 = vcombine.low %v288_v22, %v292_v23  ;;  %v1503_v35 = vcombine.low %v289_v24, %v293_v25 }
  0x58   : > { %1042 = vmatpush1.bf16.msra.mxu0 %v1485_v18  ;;  %1083 = vmatpush1.bf16.msra.mxu1 %v1487_v19  ;;  %v300_v31 = vld [vmem:[%s1989_s25 + $0x120] sm:$0xff]  ;;  %v301_v33 = vld [vmem:[%s1989_s25 + $0x128] sm:$0xff] }
  0x59   : > { %1043 = vmatprep.subr.bf16.mxu0 %v1494_v20  ;;  %1084 = vmatprep.subr.bf16.mxu1 %v1496_v21  ;;  %v1510_v36 = vcombine.high %v296_v30, %v300_v31  ;;  %v1512_v37 = vcombine.high %v297_v32, %v301_v33  ;;  %v304_v38 = vld [vmem:[%s1989_s25 + $0x140] sm:$0xff]  ;;  %v305_v40 = vld [vmem:[%s1989_s25 + $0x148] sm:$0xff]  ;;  %v1509_v42 = vcombine.low %v296_v30, %v300_v31 }
  0x5a   : > { %v308_v39 = vld [vmem:[%s1989_s25 + $0x160] sm:$0xff]  ;;  %v309_v41 = vld [vmem:[%s1989_s25 + $0x168] sm:$0xff]  ;;  %v1511_v43 = vcombine.low %v297_v32, %v301_v33 }
  0x5b   : > { %v1518_v44 = vcombine.high %v304_v38, %v308_v39  ;;  %v1520_v45 = vcombine.high %v305_v40, %v309_v41  ;;  %v312_v46 = vld [vmem:[%s1989_s25 + $0x180] sm:$0xff]  ;;  %v313_v48 = vld [vmem:[%s1989_s25 + $0x188] sm:$0xff]  ;;  %v1517_v50 = vcombine.low %v304_v38, %v308_v39  ;;  %v1519_v51 = vcombine.low %v305_v40, %v309_v41 }
  0x5c   : > { %1044 = vmatpush1.bf16.msra.mxu0 %v1493_v26  ;;  %1085 = vmatpush1.bf16.msra.mxu1 %v1495_v27  ;;  %v316_v47 = vld [vmem:[%s1989_s25 + $0x1a0] sm:$0xff]  ;;  %v317_v49 = vld [vmem:[%s1989_s25 + $0x1a8] sm:$0xff] }
  0x5d   : > { %1045 = vmatprep.subr.bf16.mxu0 %v1502_v28  ;;  %1086 = vmatprep.subr.bf16.mxu1 %v1504_v29  ;;  %v1526_v52 = vcombine.high %v312_v46, %v316_v47  ;;  %v1528_v54 = vcombine.high %v313_v48, %v317_v49  ;;  %v320_v55 = vld [vmem:[%s1989_s25 + $0x1c0] sm:$0xff]  ;;  %v321_v58 = vld [vmem:[%s1989_s25 + $0x1c8] sm:$0xff]  ;;  %v1525_v60 = vcombine.low %v312_v46, %v316_v47 }
  0x5e   : > { %v324_v56 = vld [vmem:[%s1989_s25 + $0x1e0] sm:$0xff]  ;;  %v325_v59 = vld [vmem:[%s1989_s25 + $0x1e8] sm:$0xff]  ;;  %v1527_v61 = vcombine.low %v313_v48, %v317_v49 }
  0x5f   : > { %v1534_v62 = vcombine.high %v320_v55, %v324_v56  ;;  %v1536_v63 = vcombine.high %v321_v58, %v325_v59  ;;  %v328_v0 = vld [vmem:[%s1989_s25 + $0x200] sm:$0xff]  ;;  %v329_v2 = vld [vmem:[%s1989_s25 + $0x208] sm:$0xff]  ;;  %v1533_v4 = vcombine.low %v320_v55, %v324_v56  ;;  %v1535_v5 = vcombine.low %v321_v58, %v325_v59 }
  0x60   : > { %1046 = vmatpush1.bf16.msra.mxu0 %v1501_v34  ;;  %1087 = vmatpush1.bf16.msra.mxu1 %v1503_v35  ;;  %v332_v1 = vld [vmem:[%s1989_s25 + $0x220] sm:$0xff]  ;;  %v333_v3 = vld [vmem:[%s1989_s25 + $0x228] sm:$0xff] }
  0x61   : > { %1047 = vmatprep.subr.bf16.mxu0 %v1510_v36  ;;  %1088 = vmatprep.subr.bf16.mxu1 %v1512_v37  ;;  %v1542_v6 = vcombine.high %v328_v0, %v332_v1  ;;  %v1544_v7 = vcombine.high %v329_v2, %v333_v3  ;;  %v336_v8 = vld [vmem:[%s1989_s25 + $0x240] sm:$0xff]  ;;  %v337_v10 = vld [vmem:[%s1989_s25 + $0x248] sm:$0xff]  ;;  %v1541_v12 = vcombine.low %v328_v0, %v332_v1 }
  0x62   : > { %v340_v9 = vld [vmem:[%s1989_s25 + $0x260] sm:$0xff]  ;;  %v341_v11 = vld [vmem:[%s1989_s25 + $0x268] sm:$0xff]  ;;  %v1543_v13 = vcombine.low %v329_v2, %v333_v3  ;;  %v266_v2 = vld [vmem:[%s1989_s25 + $0x10] sm:$0xff] }
  0x63   : > { %v1550_v14 = vcombine.high %v336_v8, %v340_v9  ;;  %v1552_v15 = vcombine.high %v337_v10, %v341_v11  ;;  %v344_v16 = vld [vmem:[%s1989_s25 + $0x280] sm:$0xff]  ;;  %v345_v18 = vld [vmem:[%s1989_s25 + $0x288] sm:$0xff]  ;;  %v1549_v20 = vcombine.low %v336_v8, %v340_v9  ;;  %v1551_v21 = vcombine.low %v337_v10, %v341_v11  ;;  %v270_v3 = vld [vmem:[%s1989_s25 + $0x30] sm:$0xff] }
  0x64   : > { %1048 = vmatpush1.bf16.msra.mxu0 %v1509_v42  ;;  %1089 = vmatpush1.bf16.msra.mxu1 %v1511_v43  ;;  %v348_v17 = vld [vmem:[%s1989_s25 + $0x2a0] sm:$0xff]  ;;  %v349_v19 = vld [vmem:[%s1989_s25 + $0x2a8] sm:$0xff]  ;;  %v1482_v8 = vcombine.high %v266_v2, %v270_v3  ;;  %v274_v10 = vld [vmem:[%s1989_s25 + $0x50] sm:$0xff] }
  0x65   : > { %1049 = vmatprep.subr.bf16.mxu0 %v1518_v44  ;;  %1090 = vmatprep.subr.bf16.mxu1 %v1520_v45  ;;  %v1558_v22 = vcombine.high %v344_v16, %v348_v17  ;;  %v1560_v23 = vcombine.high %v345_v18, %v349_v19  ;;  %v352_v24 = vld [vmem:[%s1989_s25 + $0x2c0] sm:$0xff]  ;;  %v353_v26 = vld [vmem:[%s1989_s25 + $0x2c8] sm:$0xff]  ;;  %v1557_v28 = vcombine.low %v344_v16, %v348_v17  ;;  %v278_v11 = vld [vmem:[%s1989_s25 + $0x70] sm:$0xff] }
  0x66   : > { %v356_v25 = vld [vmem:[%s1989_s25 + $0x2e0] sm:$0xff]  ;;  %v357_v27 = vld [vmem:[%s1989_s25 + $0x2e8] sm:$0xff]  ;;  %v1559_v29 = vcombine.low %v345_v18, %v349_v19  ;;  %v1490_v17 = vcombine.high %v274_v10, %v278_v11  ;;  %v282_v19 = vld [vmem:[%s1989_s25 + $0x90] sm:$0xff] }
  0x67   : > { %v1566_v30 = vcombine.high %v352_v24, %v356_v25  ;;  %v1568_v31 = vcombine.high %v353_v26, %v357_v27  ;;  %v360_v32 = vld [vmem:[%s1989_s25 + $0x300] sm:$0xff]  ;;  %v361_v34 = vld [vmem:[%s1989_s25 + $0x308] sm:$0xff]  ;;  %v1565_v36 = vcombine.low %v352_v24, %v356_v25  ;;  %v1567_v37 = vcombine.low %v353_v26, %v357_v27  ;;  %v290_v26 = vld [vmem:[%s1989_s25 + $0xd0] sm:$0xff] }
  0x68   : > { %1050 = vmatpush1.bf16.msra.mxu0 %v1517_v50  ;;  %1091 = vmatpush1.bf16.msra.mxu1 %v1519_v51  ;;  %v364_v33 = vld [vmem:[%s1989_s25 + $0x320] sm:$0xff]  ;;  %v365_v35 = vld [vmem:[%s1989_s25 + $0x328] sm:$0xff]  ;;  %v294_v27 = vld [vmem:[%s1989_s25 + $0xf0] sm:$0xff] }
  0x69   : > { %1051 = vmatprep.subr.bf16.mxu0 %v1526_v52  ;;  %1092 = vmatprep.subr.bf16.mxu1 %v1528_v54  ;;  %v1574_v38 = vcombine.high %v360_v32, %v364_v33  ;;  %v1576_v39 = vcombine.high %v361_v34, %v365_v35  ;;  %v368_v40 = vld [vmem:[%s1989_s25 + $0x340] sm:$0xff]  ;;  %v369_v42 = vld [vmem:[%s1989_s25 + $0x348] sm:$0xff]  ;;  %v1573_v44 = vcombine.low %v360_v32, %v364_v33 }
  0x6a   : > { %v372_v41 = vld [vmem:[%s1989_s25 + $0x360] sm:$0xff]  ;;  %v373_v43 = vld [vmem:[%s1989_s25 + $0x368] sm:$0xff]  ;;  %v1575_v45 = vcombine.low %v361_v34, %v365_v35  ;;  %v1506_v32 = vcombine.high %v290_v26, %v294_v27  ;;  %v298_v34 = vld [vmem:[%s1989_s25 + $0x110] sm:$0xff] }
  0x6b   : > { %v1582_v46 = vcombine.high %v368_v40, %v372_v41  ;;  %v1584_v47 = vcombine.high %v369_v42, %v373_v43  ;;  %v376_v48 = vld [vmem:[%s1989_s25 + $0x380] sm:$0xff]  ;;  %v377_v50 = vld [vmem:[%s1989_s25 + $0x388] sm:$0xff]  ;;  %v1581_v52 = vcombine.low %v368_v40, %v372_v41  ;;  %v1583_v54 = vcombine.low %v369_v42, %v373_v43  ;;  %v302_v35 = vld [vmem:[%s1989_s25 + $0x130] sm:$0xff] }
  0x6c   : > { %1052 = vmatpush1.bf16.msra.mxu0 %v1525_v60  ;;  %1093 = vmatpush1.bf16.msra.mxu1 %v1527_v61  ;;  %v380_v49 = vld [vmem:[%s1989_s25 + $0x3a0] sm:$0xff]  ;;  %v381_v51 = vld [vmem:[%s1989_s25 + $0x3a8] sm:$0xff]  ;;  %v306_v41 = vld [vmem:[%s1989_s25 + $0x150] sm:$0xff] }
  0x6d   : > { %1053 = vmatprep.subr.bf16.mxu0 %v1534_v62  ;;  %1094 = vmatprep.subr.bf16.mxu1 %v1536_v63  ;;  %v1590_v55 = vcombine.high %v376_v48, %v380_v49  ;;  %v1592_v56 = vcombine.high %v377_v50, %v381_v51  ;;  %v384_v58 = vld [vmem:[%s1989_s25 + $0x3c0] sm:$0xff]  ;;  %v385_v60 = vld [vmem:[%s1989_s25 + $0x3c8] sm:$0xff]  ;;  %v1589_v62 = vcombine.low %v376_v48, %v380_v49  ;;  %v310_v42 = vld [vmem:[%s1989_s25 + $0x170] sm:$0xff] }
  0x6e   : > { %v388_v59 = vld [vmem:[%s1989_s25 + $0x3e0] sm:$0xff]  ;;  %v389_v61 = vld [vmem:[%s1989_s25 + $0x3e8] sm:$0xff]  ;;  %v1591_v63 = vcombine.low %v377_v50, %v381_v51  ;;  %v307_v43 = vld [vmem:[%s1989_s25 + $0x158] sm:$0xff] }
  0x6f   : > { %v1598_v0 = vcombine.high %v384_v58, %v388_v59  ;;  %v1600_v1 = vcombine.high %v385_v60, %v389_v61  ;;  %v314_v49 = vld [vmem:[%s1989_s25 + $0x190] sm:$0xff]  ;;  %v315_v51 = vld [vmem:[%s1989_s25 + $0x198] sm:$0xff] }
  0x70   : > { %1054 = vmatpush1.bf16.msra.mxu0 %v1533_v4  ;;  %1095 = vmatpush1.bf16.msra.mxu1 %v1535_v5  ;;  %v267_v4 = vld [vmem:[%s1989_s25 + $0x18] sm:$0xff]  ;;  %v318_v50 = vld [vmem:[%s1989_s25 + $0x1b0] sm:$0xff] }
  0x71   : > { %1055 = vmatprep.subr.bf16.mxu0 %v1542_v6  ;;  %1096 = vmatprep.subr.bf16.mxu1 %v1544_v7  ;;  %v271_v5 = vld [vmem:[%s1989_s25 + $0x38] sm:$0xff]  ;;  %v1597_v6 = vcombine.low %v384_v58, %v388_v59  ;;  %v1599_v7 = vcombine.low %v385_v60, %v389_v61  ;;  %v322_v59 = vld [vmem:[%s1989_s25 + $0x1d0] sm:$0xff] }
  0x72   : > { %v1484_v9 = vcombine.high %v267_v4, %v271_v5  ;;  %v1483_v16 = vcombine.low %v267_v4, %v271_v5  ;;  %v326_v60 = vld [vmem:[%s1989_s25 + $0x1f0] sm:$0xff]  ;;  %v323_v61 = vld [vmem:[%s1989_s25 + $0x1d8] sm:$0xff] }
  0x73   : > { %v334_v4 = vld [vmem:[%s1989_s25 + $0x230] sm:$0xff]  ;;  %v331_v5 = vld [vmem:[%s1989_s25 + $0x218] sm:$0xff] }
  0x74   : > { %1056 = vmatpush1.bf16.msra.mxu0 %v1541_v12  ;;  %1097 = vmatpush1.bf16.msra.mxu1 %v1543_v13  ;;  %v2076_v12 = vcombine.low %v2024_v53, %v2024_v53  ;;  %v275_v13 = vld [vmem:[%s1989_s25 + $0x58] sm:$0xff] }
  0x75   : > { %1057 = vmatprep.subr.bf16.mxu0 %v1550_v14  ;;  %1098 = vmatprep.subr.bf16.mxu1 %v1552_v15  ;;  %v279_v14 = vld [vmem:[%s1989_s25 + $0x78] sm:$0xff]  ;;  %v1481_v15 = vcombine.low %v266_v2, %v270_v3  ;;  %v330_v3 = vld [vmem:[%s1989_s25 + $0x210] sm:$0xff] }
  0x76   : > { %v1492_v18 = vcombine.high %v275_v13, %v279_v14  ;;  %v283_v53 = vld [vmem:[%s1989_s25 + $0x98] sm:$0xff] }
  0x78   : > { %1058 = vmatpush1.bf16.msra.mxu0 %v1549_v20  ;;  %1099 = vmatpush1.bf16.msra.mxu1 %v1551_v21  ;;  %v286_v20 = vld [vmem:[%s1989_s25 + $0xb0] sm:$0xff]  ;;  %v287_v21 = vld [vmem:[%s1989_s25 + $0xb8] sm:$0xff] }
  0x79   : > { %1059 = vmatprep.subr.bf16.mxu0 %v1558_v22  ;;  %1100 = vmatprep.subr.bf16.mxu1 %v1560_v23  ;;  %v1489_v22 = vcombine.low %v274_v10, %v278_v11  ;;  %v1491_v23 = vcombine.low %v275_v13, %v279_v14  ;;  %v1498_v24 = vcombine.high %v282_v19, %v286_v20  ;;  %v338_v11 = vld [vmem:[%s1989_s25 + $0x250] sm:$0xff]  ;;  %v339_v14 = vld [vmem:[%s1989_s25 + $0x258] sm:$0xff] }
  0x7a   : > { %v1500_v25 = vcombine.high %v283_v53, %v287_v21  ;;  %v342_v13 = vld [vmem:[%s1989_s25 + $0x270] sm:$0xff] }
  0x7c   : > { %1060 = vmatpush1.bf16.msra.mxu0 %v1557_v28  ;;  %1101 = vmatpush1.bf16.msra.mxu1 %v1559_v29  ;;  %v291_v28 = vld [vmem:[%s1989_s25 + $0xd8] sm:$0xff] }
  0x7d   : > { %1061 = vmatprep.subr.bf16.mxu0 %v1566_v30  ;;  %1102 = vmatprep.subr.bf16.mxu1 %v1568_v31  ;;  %v295_v29 = vld [vmem:[%s1989_s25 + $0xf8] sm:$0xff]  ;;  %v1497_v30 = vcombine.low %v282_v19, %v286_v20  ;;  %v1499_v31 = vcombine.low %v283_v53, %v287_v21  ;;  %v346_v20 = vld [vmem:[%s1989_s25 + $0x290] sm:$0xff] }
  0x7e   : > { %v1508_v33 = vcombine.high %v291_v28, %v295_v29  ;;  %v350_v53 = vld [vmem:[%s1989_s25 + $0x2b0] sm:$0xff]  ;;  %v347_v21 = vld [vmem:[%s1989_s25 + $0x298] sm:$0xff] }
  0x80   : > { %1062 = vmatpush1.bf16.msra.mxu0 %v1565_v36  ;;  %1103 = vmatpush1.bf16.msra.mxu1 %v1567_v37  ;;  %v299_v36 = vld [vmem:[%s1989_s25 + $0x118] sm:$0xff] }
  0x81   : > { %1063 = vmatprep.subr.bf16.mxu0 %v1574_v38  ;;  %1104 = vmatprep.subr.bf16.mxu1 %v1576_v39  ;;  %v303_v37 = vld [vmem:[%s1989_s25 + $0x138] sm:$0xff]  ;;  %v1505_v38 = vcombine.low %v290_v26, %v294_v27  ;;  %v1514_v39 = vcombine.high %v298_v34, %v302_v35  ;;  %v354_v27 = vld [vmem:[%s1989_s25 + $0x2d0] sm:$0xff] }
  0x82   : > { %v1516_v40 = vcombine.high %v299_v36, %v303_v37 }
  0x84   : > { %1064 = vmatpush1.bf16.msra.mxu0 %v1573_v44  ;;  %1105 = vmatpush1.bf16.msra.mxu1 %v1575_v45  ;;  %v311_v44 = vld [vmem:[%s1989_s25 + $0x178] sm:$0xff]  ;;  %v1513_v45 = vcombine.low %v298_v34, %v302_v35  ;;  %v362_v35 = vld [vmem:[%s1989_s25 + $0x310] sm:$0xff] }
  0x85   : > { %1065 = vmatprep.subr.bf16.mxu0 %v1582_v46  ;;  %1106 = vmatprep.subr.bf16.mxu1 %v1584_v47  ;;  %v1515_v46 = vcombine.low %v299_v36, %v303_v37  ;;  %v1522_v47 = vcombine.high %v306_v41, %v310_v42  ;;  %v1524_v48 = vcombine.high %v307_v43, %v311_v44  ;;  %v366_v36 = vld [vmem:[%s1989_s25 + $0x330] sm:$0xff]  ;;  %v363_v37 = vld [vmem:[%s1989_s25 + $0x318] sm:$0xff] }
  0x88   : > { %1066 = vmatpush1.bf16.msra.mxu0 %v1581_v52  ;;  %1107 = vmatpush1.bf16.msra.mxu1 %v1583_v54  ;;  %v319_v52 = vld [vmem:[%s1989_s25 + $0x1b8] sm:$0xff]  ;;  %v1521_v54 = vcombine.low %v306_v41, %v310_v42  ;;  %v370_v42 = vld [vmem:[%s1989_s25 + $0x350] sm:$0xff] }
  0x89   : > { %1067 = vmatprep.subr.bf16.mxu0 %v1590_v55  ;;  %1108 = vmatprep.subr.bf16.mxu1 %v1592_v56  ;;  %v1523_v55 = vcombine.low %v307_v43, %v311_v44  ;;  %v1530_v56 = vcombine.high %v314_v49, %v318_v50  ;;  %v1532_v58 = vcombine.high %v315_v51, %v319_v52  ;;  %v374_v43 = vld [vmem:[%s1989_s25 + $0x370] sm:$0xff]  ;;  %v371_v44 = vld [vmem:[%s1989_s25 + $0x358] sm:$0xff] }
  0x8c   : > { %1068 = vmatpush1.bf16.msra.mxu0 %v1589_v62  ;;  %1109 = vmatpush1.bf16.msra.mxu1 %v1591_v63  ;;  %v327_v62 = vld [vmem:[%s1989_s25 + $0x1f8] sm:$0xff]  ;;  %v1529_v63 = vcombine.low %v314_v49, %v318_v50  ;;  %v378_v50 = vld [vmem:[%s1989_s25 + $0x390] sm:$0xff] }
  0x8d   : > { %1069 = vmatprep.subr.bf16.mxu0 %v1598_v0  ;;  %1110 = vmatprep.subr.bf16.mxu1 %v1600_v1  ;;  %v1531_v0 = vcombine.low %v315_v51, %v319_v52  ;;  %v1538_v1 = vcombine.high %v322_v59, %v326_v60  ;;  %v1540_v2 = vcombine.high %v323_v61, %v327_v62  ;;  %v382_v51 = vld [vmem:[%s1989_s25 + $0x3b0] sm:$0xff]  ;;  %v379_v52 = vld [vmem:[%s1989_s25 + $0x398] sm:$0xff] }
  0x90   : > { %1070 = vmatpush1.bf16.msra.mxu0 %v1597_v6  ;;  %1111 = vmatpush1.bf16.msra.mxu1 %v1599_v7  ;;  %v335_v6 = vld [vmem:[%s1989_s25 + $0x238] sm:$0xff]  ;;  %v1537_v7 = vcombine.low %v322_v59, %v326_v60  ;;  %v386_v60 = vld [vmem:[%s1989_s25 + $0x3d0] sm:$0xff] }
  0x91   : > { %1121 = vmatprep.subr.bf16.mxu0 %v1482_v8  ;;  %1162 = vmatprep.subr.bf16.mxu1 %v1484_v9  ;;  %v1539_v8 = vcombine.low %v323_v61, %v327_v62  ;;  %v1546_v9 = vcombine.high %v330_v3, %v334_v4  ;;  %v1548_v10 = vcombine.high %v331_v5, %v335_v6  ;;  %v390_v61 = vld [vmem:[%s1989_s25 + $0x3f0] sm:$0xff]  ;;  %v387_v62 = vld [vmem:[%s1989_s25 + $0x3d8] sm:$0xff] }
  0x93   : > { %1072 = vmatmul.mubr.bf16.vlgmr.msra.gmra.mrb[0].mxu0 %v2076_v12  ;;  %1113 = vmatmul.mubr.bf16.vlgmr.msra.gmra.mrb[0].mxu1 %v2076_v12 }
  0x94   : > { %1122 = vmatpush1.bf16.msra.mxu0 %v1481_v15  ;;  %1163 = vmatpush1.bf16.msra.mxu1 %v1483_v16  ;;  %v343_v15 = vld [vmem:[%s1989_s25 + $0x278] sm:$0xff]  ;;  %v1545_v16 = vcombine.low %v330_v3, %v334_v4  ;;  %v1601_v4 = vcombine.low %v386_v60, %v390_v61 }
  0x95   : > { %1123 = vmatprep.subr.bf16.mxu0 %v1490_v17  ;;  %1164 = vmatprep.subr.bf16.mxu1 %v1492_v18  ;;  %v1547_v17 = vcombine.low %v331_v5, %v335_v6  ;;  %v1554_v18 = vcombine.high %v338_v11, %v342_v13  ;;  %v1556_v19 = vcombine.high %v339_v14, %v343_v15 }
  0x96   : > { %1153 = vmatprep.mubr.bf16.mxu0 %v2030_v57  ;;  %1194 = vmatprep.mubr.bf16.mxu1 %v2030_v57  ;;  %v1507_v57 = vcombine.low %v291_v28, %v295_v29  ;;  %v358_v28 = vld [vmem:[%s1989_s25 + $0x2f0] sm:$0xff]  ;;  %v355_v29 = vld [vmem:[%s1989_s25 + $0x2d8] sm:$0xff] }
  0x98   : > { %1124 = vmatpush1.bf16.msra.mxu0 %v1489_v22  ;;  %1165 = vmatpush1.bf16.msra.mxu1 %v1491_v23  ;;  %v351_v22 = vld [vmem:[%s1989_s25 + $0x2b8] sm:$0xff]  ;;  %v1553_v23 = vcombine.low %v338_v11, %v342_v13 }
  0x99   : > { %1125 = vmatprep.subr.bf16.mxu0 %v1498_v24  ;;  %1166 = vmatprep.subr.bf16.mxu1 %v1500_v25  ;;  %v1555_v24 = vcombine.low %v339_v14, %v343_v15  ;;  %v1562_v25 = vcombine.high %v346_v20, %v350_v53  ;;  %v1564_v26 = vcombine.high %v347_v21, %v351_v22 }
  0x9c   : > { %1126 = vmatpush1.bf16.msra.mxu0 %v1497_v30  ;;  %1167 = vmatpush1.bf16.msra.mxu1 %v1499_v31  ;;  %v359_v30 = vld [vmem:[%s1989_s25 + $0x2f8] sm:$0xff]  ;;  %v1561_v31 = vcombine.low %v346_v20, %v350_v53 }
  0x9d   : > { %1127 = vmatprep.subr.bf16.mxu0 %v1506_v32  ;;  %1168 = vmatprep.subr.bf16.mxu1 %v1508_v33  ;;  %v1563_v32 = vcombine.low %v347_v21, %v351_v22  ;;  %v1570_v33 = vcombine.high %v354_v27, %v358_v28  ;;  %v1572_v34 = vcombine.high %v355_v29, %v359_v30 }
  0xa0   : > { %1128 = vmatpush1.bf16.msra.mxu0 %v1505_v38  ;;  %1169 = vmatpush1.bf16.msra.mxu1 %v1507_v57  ;;  %v367_v38 = vld [vmem:[%s1989_s25 + $0x338] sm:$0xff]  ;;  %v1569_v57 = vcombine.low %v354_v27, %v358_v28  ;;  %v1817_v28 = vmov -inf  }
  0xa1   : > { %1129 = vmatprep.subr.bf16.mxu0 %v1514_v39  ;;  %1170 = vmatprep.subr.bf16.mxu1 %v1516_v40  ;;  %v1571_v39 = vcombine.low %v355_v29, %v359_v30  ;;  %v1578_v40 = vcombine.high %v362_v35, %v366_v36  ;;  %v1580_v41 = vcombine.high %v363_v37, %v367_v38  ;;  %v1818_v29 = vmov 0  }
  0xa2   : > { %260 = vst.msk [vmem:[#allocation2] sm:$0xff] %vm259_vm0, %v1817_v28  ;;  %1674 = vset.pattern.permute.xlu0 %v1818_v29  ;;  %262 = vst.msk [vmem:[#allocation4] sm:$0xff] %vm259_vm0, %v1818_v29  ;;  %v1819_v30 = vmov 0.0  }
  0xa3   : > { %261 = vst.msk [vmem:[#allocation3] sm:$0xff] %vm259_vm0, %v1819_v30 }
  0xa4   : > { %1130 = vmatpush1.bf16.msra.mxu0 %v1513_v45  ;;  %1171 = vmatpush1.bf16.msra.mxu1 %v1515_v46  ;;  %v375_v45 = vld [vmem:[%s1989_s25 + $0x378] sm:$0xff]  ;;  %v1577_v46 = vcombine.low %v362_v35, %v366_v36 }
  0xa5   : > { %1131 = vmatprep.subr.bf16.mxu0 %v1522_v47  ;;  %1172 = vmatprep.subr.bf16.mxu1 %v1524_v48  ;;  %v1579_v47 = vcombine.low %v363_v37, %v367_v38  ;;  %v1586_v48 = vcombine.high %v370_v42, %v374_v43  ;;  %v1588_v49 = vcombine.high %v371_v44, %v375_v45 }
  0xa8   : > { %1132 = vmatpush1.bf16.msra.mxu0 %v1521_v54  ;;  %1173 = vmatpush1.bf16.msra.mxu1 %v1523_v55  ;;  %v383_v54 = vld [vmem:[%s1989_s25 + $0x3b8] sm:$0xff]  ;;  %v1585_v55 = vcombine.low %v370_v42, %v374_v43 }
  0xa9   : > { %1133 = vmatprep.subr.bf16.mxu0 %v1530_v56  ;;  %1174 = vmatprep.subr.bf16.mxu1 %v1532_v58  ;;  %v1587_v56 = vcombine.low %v371_v44, %v375_v45  ;;  %v1594_v58 = vcombine.high %v378_v50, %v382_v51  ;;  %v1596_v59 = vcombine.high %v379_v52, %v383_v54 }
  0xac   : > { %1134 = vmatpush1.bf16.msra.mxu0 %v1529_v63  ;;  %1175 = vmatpush1.bf16.msra.mxu1 %v1531_v0  ;;  %v391_v63 = vld [vmem:[%s1989_s25 + $0x3f8] sm:$0xff]  ;;  %v1593_v0 = vcombine.low %v378_v50, %v382_v51 }
  0xad   : > { %1135 = vmatprep.subr.bf16.mxu0 %v1538_v1  ;;  %1176 = vmatprep.subr.bf16.mxu1 %v1540_v2  ;;  %v1595_v1 = vcombine.low %v379_v52, %v383_v54  ;;  %v1602_v2 = vcombine.high %v386_v60, %v390_v61  ;;  %v1604_v3 = vcombine.high %v387_v62, %v391_v63 }
  0xae   : > { %v1603_v5 = vcombine.low %v387_v62, %v391_v63 }
  0xb0   : > { %1136 = vmatpush1.bf16.msra.mxu0 %v1537_v7  ;;  %1177 = vmatpush1.bf16.msra.mxu1 %v1539_v8 }
  0xb1   : > { %1137 = vmatprep.subr.bf16.mxu0 %v1546_v9  ;;  %1178 = vmatprep.subr.bf16.mxu1 %v1548_v10 }
  0xb4   : > { %1138 = vmatpush1.bf16.msra.mxu0 %v1545_v16  ;;  %1179 = vmatpush1.bf16.msra.mxu1 %v1547_v17 }
  0xb5   : > { %1139 = vmatprep.subr.bf16.mxu0 %v1554_v18  ;;  %1180 = vmatprep.subr.bf16.mxu1 %v1556_v19 }
  0xb8   : > { %1140 = vmatpush1.bf16.msra.mxu0 %v1553_v23  ;;  %1181 = vmatpush1.bf16.msra.mxu1 %v1555_v24 }
  0xb9   : > { %1141 = vmatprep.subr.bf16.mxu0 %v1562_v25  ;;  %1182 = vmatprep.subr.bf16.mxu1 %v1564_v26 }
  0xbc   : > { %1142 = vmatpush1.bf16.msra.mxu0 %v1561_v31  ;;  %1183 = vmatpush1.bf16.msra.mxu1 %v1563_v32  ;;  %v1203_v31 = vlaneseq }
  0xbd   : > { %1143 = vmatprep.subr.bf16.mxu0 %v1570_v33  ;;  %1184 = vmatprep.subr.bf16.mxu1 %v1572_v34  ;;  %v2169_v33 = vld [vmem:[#allocation2] sm:$0xff] }
  0xbe   : > { %v1204_v32 = vand.u32 127, %v1203_v31 }
  0xc0   : > { %1144 = vmatpush1.bf16.msra.mxu0 %v1569_v57  ;;  %1185 = vmatpush1.bf16.msra.mxu1 %v1571_v39  ;;  %v1205_v34 = vadd.s32 128, %v1204_v32  ;;  %v1206_v35 = vadd.s32 256, %v1204_v32  ;;  %v1207_v36 = vadd.s32 384, %v1204_v32  ;;  %v1208_v38 = vadd.s32 512, %v1204_v32 }
  0xc1   : > { %1145 = vmatprep.subr.bf16.mxu0 %v1578_v40  ;;  %1186 = vmatprep.subr.bf16.mxu1 %v1580_v41  ;;  %v1209_v57 = vadd.s32 640, %v1204_v32  ;;  %v1210_v39 = vadd.s32 768, %v1204_v32  ;;  %v1211_v40 = vadd.s32 896, %v1204_v32 }
  0xc4   : > { %1146 = vmatpush1.bf16.msra.mxu0 %v1577_v46  ;;  %1187 = vmatpush1.bf16.msra.mxu1 %v1579_v47 }
  0xc5   : > { %1147 = vmatprep.subr.bf16.mxu0 %v1586_v48  ;;  %1188 = vmatprep.subr.bf16.mxu1 %v1588_v49 }
  0xc8   : > { %1148 = vmatpush1.bf16.msra.mxu0 %v1585_v55  ;;  %1189 = vmatpush1.bf16.msra.mxu1 %v1587_v56 }
  0xc9   : > { %1149 = vmatprep.subr.bf16.mxu0 %v1594_v58  ;;  %1190 = vmatprep.subr.bf16.mxu1 %v1596_v59 }
  0xcc   : > { %1150 = vmatpush1.bf16.msra.mxu0 %v1593_v0  ;;  %1191 = vmatpush1.bf16.msra.mxu1 %v1595_v1 }
  0xcd   : > { %1151 = vmatprep.subr.bf16.mxu0 %v1602_v2  ;;  %1192 = vmatprep.subr.bf16.mxu1 %v1604_v3 }
  0xd0   : > { %1152 = vmatpush1.bf16.msra.mxu0 %v1601_v4  ;;  %1193 = vmatpush1.bf16.msra.mxu1 %v1603_v5 }
  0xd3   : > { %1154 = vmatmul.mubr.bf16.vlgmr.msra.gmra.mrb[4].mxu0 %v2076_v12  ;;  %1195 = vmatmul.mubr.bf16.vlgmr.msra.gmra.mrb[4].mxu1 %v2076_v12 }
 0x166   : > { %v2142_v6 = vpop.f32.mrb[0].mxu0  ;;  %v2144_v7 = vpop.f32.mrb[0].mxu1 }
 0x167   : > { %v2146_v8 = vpop.f32.mrb[1].mxu0  ;;  %v2148_v9 = vpop.f32.mrb[1].mxu1 }
 0x168   : > { %v1077_v10 = vpop.f32.mrb[2].mxu0  ;;  %v1118_v11 = vpop.f32.mrb[2].mxu1 }
 0x169   : > { %v1078_v13 = vpop.f32.mrb[3].mxu0  ;;  %v1119_v14 = vpop.f32.mrb[3].mxu1 }
 0x1a6   : > { %v2150_v15 = vpop.f32.mrb[4].mxu0  ;;  %v2154_v17 = vpop.f32.mrb[4].mxu1 }
 0x1a7   : > { %v1212_v16 = vmax.f32 %v2142_v6, %v2150_v15  ;;  %v2156_v12 = vpop.f32.mrb[5].mxu0  ;;  %v1214_v18 = vmax.f32 %v2144_v7, %v2154_v17  ;;  %v2162_v20 = vpop.f32.mrb[5].mxu1 }
 0x1a8   : > { %v1213_v19 = vmax.f32 %v2146_v8, %v2156_v12  ;;  %v1159_v53 = vpop.f32.mrb[6].mxu0  ;;  %v1215_v21 = vmax.f32 %v2148_v9, %v2162_v20  ;;  %v1200_v22 = vpop.f32.mrb[6].mxu1 }
 0x1a9   : > { %v1160_v23 = vpop.f32.mrb[7].mxu0  ;;  %v1201_v24 = vpop.f32.mrb[7].mxu1 }
 0x1aa   : > { %v1216_v25 = vmax.f32 %v1212_v16, %v1213_v19  ;;  %v1217_v26 = vmax.f32 %v1214_v18, %v1215_v21 }
 0x1ac   : > { %v1218_v27 = vmax.f32 %v1216_v25, %v1217_v26 }
 0x1ae   : > { %1219 = vmax.xlane.f32.xlu0 %v1218_v27 }
 0x23b   : > { %v2171_v37 = vpop.xlane.xlu0 %1219 }
 0x23c   : > { %v2175_v41 = vmax.f32 %v2169_v33, %v2171_v37  ;;  %vm1221_vm1 = vcmp.eq.f32.partialorder %v2142_v6, %v2171_v37  ;;  %vm1222_vm2 = vcmp.eq.f32.partialorder %v2146_v8, %v2171_v37  ;;  %vm1223_vm3 = vcmp.eq.f32.partialorder %v2144_v7, %v2171_v37 }
 0x23d   : > { %vm1224_vm4 = vcmp.eq.f32.partialorder %v2148_v9, %v2171_v37  ;;  %vm1225_vm5 = vcmp.eq.f32.partialorder %v2150_v15, %v2171_v37  ;;  %vm1226_vm6 = vcmp.eq.f32.partialorder %v2156_v12, %v2171_v37  ;;  %vm1227_vm7 = vcmp.eq.f32.partialorder %v2154_v17, %v2171_v37 }
 0x23e   : > { %1277 = vperm.xlu0 %1674, %v2175_v41   ;;  %v1271_v42 = vsub.f32 %v2169_v33, %v2175_v41  ;;  %vm1228_vm8 = vcmp.eq.f32.partialorder %v2162_v20, %v2171_v37  ;;  %v1229_v43 = vsel %vm1221_vm1, %v1204_v32, 2147483647  ;;  %v1230_v44 = vsel %vm1222_vm2, %v1205_v34, 2147483647  ;;  %1321 = vst.msk [vmem:[#allocation2] sm:$0xff] %vm259_vm0, %v2175_v41 }
 0x23f   : > { %v1231_v45 = vsel %vm1223_vm3, %v1206_v35, 2147483647  ;;  %v1232_v46 = vsel %vm1224_vm4, %v1207_v36, 2147483647  ;;  %v1233_v47 = vsel %vm1225_vm5, %v1208_v38, 2147483647  ;;  %vm1317_vm2 = vcmp.gt.f32.partialorder %v2171_v37, %v2169_v33 }
 0x240   : > { %v1234_v48 = vsel %vm1226_vm6, %v1209_v57, 2147483647  ;;  %v1235_v49 = vsel %vm1227_vm7, %v1210_v39, 2147483647  ;;  %vm1237_vm9 = vcmp.lt.s32.totalorder %v1229_v43, %v1233_v47  ;;  %v1236_v50 = vsel %vm1228_vm8, %v1211_v40, 2147483647 }
 0x241   : > { %v1238_v51 = vsel %vm1237_vm9, %v1229_v43, %v1233_v47  ;;  %vm1239_vm10 = vcmp.lt.s32.totalorder %v1230_v44, %v1234_v48  ;;  %vm1241_vm11 = vcmp.lt.s32.totalorder %v1231_v45, %v1235_v49  ;;  %vm1243_vm12 = vcmp.lt.s32.totalorder %v1232_v46, %v1236_v50  ;;  %v1270_v36 = vld [vmem:[#allocation3] sm:$0xff] }
 0x242   : > { %v1240_v52 = vsel %vm1239_vm10, %v1230_v44, %v1234_v48  ;;  %v1242_v54 = vsel %vm1241_vm11, %v1231_v45, %v1235_v49  ;;  %v1244_v55 = vsel %vm1243_vm12, %v1232_v46, %v1236_v50  ;;  %v1272_v34 = vmul.f32 1.442695, %v1271_v42  ;;  %v1318_v46 = vld [vmem:[#allocation4] sm:$0xff] }
 0x243   : > { %vm1245_vm13 = vcmp.lt.s32.totalorder %v1238_v51, %v1240_v52  ;;  %vm1247_vm14 = vcmp.lt.s32.totalorder %v1242_v54, %v1244_v55 }
 0x244   : > { %v1246_v56 = vsel %vm1245_vm13, %v1238_v51, %v1240_v52  ;;  %v1248_v58 = vsel %vm1247_vm14, %v1242_v54, %v1244_v55 }
 0x245   : > { %vm1249_vm15 = vcmp.lt.s32.totalorder %v1246_v56, %v1248_v58 }
 0x246   : > { %v1250_v59 = vsel %vm1249_vm15, %v1246_v56, %v1248_v58 }
 0x247   : > { %v1252_v60 = vshra.s32 %v1250_v59, 16  ;;  %v1251_v29 = vand.u32 65535, %v1250_v59 }
 0x249   : > { %v1254_v61 = vcvt.s32.f32 %v1252_v60  ;;  %v1253_v31 = vcvt.s32.f32 %v1251_v29 }
 0x24b   : > { %1255 = vmin.xlane.f32.xlu1 %v1254_v61 }
 0x2bd   : > { %v1278_v62 = vpop.permute.xlu0 %1277 }
 0x2be   : > { %v1280_v63 = vsub.f32 %v2142_v6, %v1278_v62  ;;  %v1281_v0 = vsub.f32 %v2146_v8, %v1278_v62  ;;  %v1282_v1 = vsub.f32 %v2144_v7, %v1278_v62  ;;  %v1283_v2 = vsub.f32 %v2148_v9, %v1278_v62 }
 0x2bf   : > { %v1284_v5 = vsub.f32 %v2150_v15, %v1278_v62  ;;  %v1285_v11 = vsub.f32 %v2156_v12, %v1278_v62  ;;  %v1286_v6 = vsub.f32 %v2154_v17, %v1278_v62  ;;  %v1287_v7 = vsub.f32 %v2162_v20, %v1278_v62 }
 0x2c0   : > { %v1288_v3 = vmul.f32 1.442695, %v1280_v63  ;;  %v1290_v4 = vmul.f32 1.442695, %v1281_v0  ;;  %v1292_v10 = vmul.f32 1.442695, %v1282_v1 }
 0x2c1   : > { %v1294_v13 = vmul.f32 1.442695, %v1283_v2  ;;  %v1296_v14 = vmul.f32 1.442695, %v1284_v5  ;;  %v1298_v8 = vmul.f32 1.442695, %v1285_v11 }
 0x2c2   : > { %1677 = vpow2.f32 %v1288_v3  ;;  %v1300_v9 = vmul.f32 1.442695, %v1286_v6  ;;  %v1302_v16 = vmul.f32 1.442695, %v1287_v7 }
 0x2c3   : > { %1679 = vpow2.f32 %v1290_v4 }
 0x2c4   : > { %1681 = vpow2.f32 %v1292_v10 }
 0x2c5   : > { %1683 = vpow2.f32 %v1294_v13 }
 0x2c6   : > { %1685 = vpow2.f32 %v1296_v14 }
 0x2c7   : > { %1687 = vpow2.f32 %v1298_v8 }
 0x2c8   : > { %1689 = vpow2.f32 %v1300_v9 }
 0x2c9   : > { %1691 = vpow2.f32 %v1302_v16 }
 0x2ca   : > { %1693 = vpow2.f32 %v1272_v34 }
 0x2cc   : > { %v1678_v18 = vpop.eup %1677 }
 0x2cd   : > { %v1680_v15 = vpop.eup %1679 }
 0x2ce   : > { %v1304_v19 = vadd.f32 %v1680_v15, %v1678_v18  ;;  %v1682_v53 = vpop.eup %1681 }
 0x2cf   : > { %v1684_v21 = vpop.eup %1683 }
 0x2d0   : > { %v1305_v12 = vadd.f32 %v1682_v53, %v1304_v19  ;;  %v1686_v23 = vpop.eup %1685 }
 0x2d1   : > { %v1688_v17 = vpop.eup %1687 }
 0x2d2   : > { %v1306_v22 = vadd.f32 %v1684_v21, %v1305_v12  ;;  %v1690_v26 = vpop.eup %1689 }
 0x2d3   : > { %v1692_v20 = vpop.eup %1691 }
 0x2d4   : > { %v1307_v24 = vadd.f32 %v1686_v23, %v1306_v22  ;;  %v1694_v35 = vpop.eup %1693 }
 0x2d5   : > { %v1274_v38 = vmul.f32 %v1694_v35, %v1270_v36 }
 0x2d6   : > { %v1308_v25 = vadd.f32 %v1688_v17, %v1307_v24 }
 0x2d8   : > { %v1309_v27 = vadd.f32 %v1690_v26, %v1308_v25  ;;  %v1256_v28 = vpop.xlane.xlu1 %1255 }
 0x2d9   : > { %vm1257_vm1 = vcmp.eq.f32.partialorder %v1254_v61, %v1256_v28  ;;  %v1262_v39 = vcvt.f32.s32 %v1256_v28 }
 0x2da   : > { %v1310_v30 = vadd.f32 %v1692_v20, %v1309_v27  ;;  %v1258_v32 = vsel %vm1257_vm1, %v1253_v31, inf }
 0x2db   : > { %v1263_v44 = vshll.u32 %v1262_v39, 16 }
 0x2dc   : > { %1311 = vadd.xlane.f32.xlu1 %v1310_v30 }
 0x2e0   : > { %1259 = vmin.xlane.f32.xlu1 %v1258_v32 }
 0x369   : > { %v1312_v57 = vpop.xlane.xlu1 %1311 }
 0x36a   : > { %v1313_v40 = vadd.f32 %v1312_v57, %v1274_v38 }
 0x36c   : > { %1315 = vst.msk [vmem:[#allocation3] sm:$0xff] %vm259_vm0, %v1313_v40 }
 0x36d   : > { %v1260_v43 = vpop.xlane.xlu1 %1259 }
 0x36e   : > { %v1261_v45 = vcvt.f32.s32 %v1260_v43 }
 0x370   : > { %v1264_v47 = vadd.s32 %v1263_v44, %v1261_v45 }
 0x372   : > { %v1319_v41 = vsel %vm1317_vm2, %v1264_v47, %v1318_v46 }
 0x373   : > { %v1325_v42 = vld [vmem:[#allocation3] sm:$0xff]  ;;  %1320 = vst.msk [vmem:[#allocation4] sm:$0xff] %vm259_vm0, %v1319_v41 }
 0x374   : > { %1695 = vrcp.f32 %v1325_v42 }
 0x37a   : > { %v1328_v48 = vld [vmem:[#allocation4] sm:$0xff] }
 0x37b   : > { %1329 = vst.msk [vmem:[%s254_s11] sm:$0xff] %vm259_vm0, %v1328_v48 }
 0x37e   : > { %v1696_v49 = vpop.eup %1695 }
 0x37f   : > { %1327 = vst.msk [vmem:[%s250_s21] sm:$0xff] %vm259_vm0, %v1696_v49 }
 0x380 PF: > { %s20_s17 = sadd.s32 1, %s1811_s17   ;;  %s2253_s12 = smov %s1795_s13 }
 0x381   : > { %p17_p13 = scmp.ge.s32.totalorder %s20_s17, 4   ;;  %s2254_s13 = smov %s1799_s14 }
 0x382   : > { %s2255_s14 = smov %s1889_s24  ;;  %s2256_s15 = smov %s1807_s16 }
 0x383   : > { %s2257_s16 = smov %s2259_s19  ;;  %19 = sbr.rel (!%p17_p13) target bundleno = 6 (0x6), region = 101 }
 0x38a   :  { %1363 = vsyncpa [#allocation6], 1 }
 0x38b   :  { %1365 = vsyncpa [#allocation6 + $0x1], 1 }
 0x38c   :  { %1366 = vsyncpa [#allocation8], 1 }
 0x38d   :  { %1368 = vsyncpa [#allocation8 + $0x1], 1 }

</bundles_post_ra>
